<compile_context>
chip_gen: v6e
topology: v6e:2x2x1
jax: 0.10.0
libtpu: 0.0.40
codegen_flags: <defaults>
</compile_context>

<pallas_src>
import jax
import jax.numpy as jnp
from jax.experimental import pallas as pl
from jax.experimental.pallas import tpu as pltpu


EPS = 1e-5


# ----------------------------------------------------------------------------
# Kernel: per-(n,c) instance norm + AdaIN modulation on one row block.
#   gb_ref : (row_tile, 2) f32 block  (col 0 = gamma, col 1 = beta)
#   x_ref  : (row_tile, H*W) block of the flattened input
#   o_ref  : (row_tile, H*W) block of the output
# ----------------------------------------------------------------------------
def adain_kernel(gb_ref, x_ref, o_ref):
    hw = x_ref.shape[1]

    gamma = gb_ref[:, 0:1]                      # (row_tile, 1) f32
    beta = gb_ref[:, 1:2]                       # (row_tile, 1) f32

    # Single-pass reduction: sum and sum-of-squares over one read of the block.
    # TODO(synk): if a v7x profile shows the two lane reductions (XLU) binding
    # instead of HBM, offload them to the idle MXU (x @ ones, (x*x) @ ones).
    x = x_ref[...].astype(jnp.float32)
    inv_hw = jnp.float32(1.0 / hw)
    s1 = jnp.sum(x, axis=1, keepdims=True)
    s2 = jnp.sum(x * x, axis=1, keepdims=True)
    mean = s1 * inv_hw
    var = jnp.maximum(s2 * inv_hw - mean * mean, 0.0)   # biased var, clamped

    # (1 + gamma) * (x - mean) * rsqrt(var + eps) + beta  ==  x*scale + shift
    scale = (1.0 + gamma) * jax.lax.rsqrt(var + EPS)
    shift = beta - mean * scale

    # Re-read the ref for the epilogue so the f32 copy of the whole block does
    # not stay live across both phases (matters most for bf16 inputs).
    o_ref[...] = (x_ref[...].astype(jnp.float32) * scale + shift).astype(o_ref.dtype)


# ----------------------------------------------------------------------------
# Wrapper helpers.
# ----------------------------------------------------------------------------
def _vmem_capacity_bytes():
    """Physical VMEM of the current part; conservative fallback if unknown."""
    try:
        return int(pltpu.get_tpu_info().vmem_capacity_bytes)
    except Exception:
        return 64 << 20   # conservative (v7x-sized) fallback


def _choose_row_tile(rows, hw, itemsize, vmem_cap_bytes):
    """Pick a row tile for a mem-bound kernel, generation-aware."""
    sub = 16 if itemsize < 4 else 8              # sublane granularity
    if rows <= sub:
        return int(rows)                         # single block == full row extent

    small_vmem = vmem_cap_bytes < (96 << 20)     # v7x-class (64 MiB) vs 128 MiB
    target_bytes = (2 << 20) if small_vmem else (4 << 20)

    row_bytes = max(1, hw * itemsize)
    rt = max(sub, (target_bytes // row_bytes) // sub * sub)
    rows_al = pl.cdiv(rows, sub) * sub
    rt = min(rt, rows_al)

    steps = pl.cdiv(rows, rt)
    # Prefer >= 2 grid steps so v7x's two TensorCores both get work.
    if steps == 1 and rows_al >= 2 * sub:
        rt = max(sub, (rows_al // 2 // sub) * sub)
        steps = pl.cdiv(rows, rt)
    # Prefer an even number of steps (cheap; only helps the 2-TC part).
    if steps > 1 and steps % 2 == 1:
        rt2 = max(sub, pl.cdiv(pl.cdiv(rows, steps + 1), sub) * sub)
        if pl.cdiv(rows, rt2) % 2 == 0:
            rt = rt2
    return int(rt)


def adain_forward(x, s, w_t, b):
    """x: (N, C, H, W), s: (N, style_dim), w_t: (style_dim, 2C) == W^T, b: (1, 2C)."""
    n, c, h, w = x.shape
    rows = n * c
    hw = h * w

    # --- style projection (XLA): tiny matmul, not worth a kernel launch ------
    hvec = jnp.dot(s.astype(jnp.float32), w_t.astype(jnp.float32),
                   preferred_element_type=jnp.float32) + b.astype(jnp.float32)
    gamma = hvec[:, :c].reshape(rows)            # row r = n*C + c -> hvec[n, c]
    beta = hvec[:, c:].reshape(rows)
    gb = jnp.stack([gamma, beta], axis=1)        # (rows, 2) f32

    # --- flatten; NO padding / NO output slice (ragged last block is fine) ---
    # NOTE: if H*W is not a multiple of 128 the lane layout pads and stores
    # become masked; pad the feature map once upstream if that matters.
    x_flat = x.reshape(rows, hw)

    vmem_cap = _vmem_capacity_bytes()
    itemsize = x_flat.dtype.itemsize
    row_tile = _choose_row_tile(rows, hw, itemsize, vmem_cap)
    grid = (pl.cdiv(rows, row_tile),)

    # VMEM budget from the real buffers: double-buffered in+out x blocks,
    # double-buffered lane-padded gb blocks, the f32 upcast live during the
    # reduction, plus headroom.  Capped well under physical VMEM.
    block_bytes = row_tile * hw * itemsize
    gb_block_bytes = row_tile * 128 * 4          # (row_tile, 2) f32 lane-pads to 128
    f32_live = row_tile * hw * 4
    est = 2 * (2 * block_bytes) + 2 * gb_block_bytes + f32_live + (4 << 20)
    cap = (48 << 20) if vmem_cap < (96 << 20) else (96 << 20)
    vmem_limit = int(min(max(est, 32 << 20), cap))
    # TODO(synk): for very large H*W (one 8-row slab alone exceeding the cap),
    # add a second "arbitrary" grid axis over H*W with online sum/sumsq
    # accumulation so the block size stays bounded on v7x's 64 MiB VMEM.

    out_flat = pl.pallas_call(
        adain_kernel,
        out_shape=jax.ShapeDtypeStruct((rows, hw), x.dtype),
        grid_spec=pltpu.PrefetchScalarGridSpec(
            num_scalar_prefetch=0,
            grid=grid,
            in_specs=[
                # Per-step gamma/beta block: same row indexing (and edge
                # clamping) as x.  Its DMA hides under the multi-MiB x DMA.
                pl.BlockSpec((row_tile, 2), lambda i: (i, 0)),
                pl.BlockSpec((row_tile, hw), lambda i: (i, 0)),
            ],
            out_specs=pl.BlockSpec((row_tile, hw), lambda i: (i, 0)),
        ),
        compiler_params=pltpu.CompilerParams(
            dimension_semantics=("parallel",),
            vmem_limit_bytes=vmem_limit,
        ),
    )(gb, x_flat)

    return out_flat.reshape(n, c, h, w)


# ----------------------------------------------------------------------------
# Pure-JAX reference for verification.
# ----------------------------------------------------------------------------
def adain_ref(x, s, w_t, b):
    n, c, _, _ = x.shape
    hvec = s @ w_t + b[0]
    gamma = hvec[:, :c].reshape(n, c, 1, 1)
    beta = hvec[:, c:].reshape(n, c, 1, 1)
    mean = jnp.mean(x, axis=(2, 3), keepdims=True)
    var = jnp.mean((x - mean) ** 2, axis=(2, 3), keepdims=True)
    x_hat = (x - mean) / jnp.sqrt(var + EPS)
    return (1.0 + gamma) * x_hat + beta


if __name__ == "__main__":
    key = jax.random.PRNGKey(0)
    k_x, k_s, k_w, k_b = jax.random.split(key, 4)

    # Small shapes consistent with the module.
    N, C, H, W = 2, 4, 16, 16
    STYLE_DIM = 8

    x = jax.random.normal(k_x, (N, C, H, W), dtype=jnp.float32)
    s = jax.random.normal(k_s, (N, STYLE_DIM), dtype=jnp.float32)

    # Deterministic nn.Linear(style_dim, 2*C) parameters (synthetic init),
    # stored pre-transposed: w_t has shape (style_dim, 2*C) == W^T.
    bound = 1.0 / (STYLE_DIM ** 0.5)
    w_t = jax.random.uniform(k_w, (STYLE_DIM, 2 * C), jnp.float32, -bound, bound)
    b = jax.random.uniform(k_b, (1, 2 * C), jnp.float32, -bound, bound)

    run = jax.jit(adain_forward)
    out = jax.block_until_ready(run(x, s, w_t, b))

    ref = adain_ref(x, s, w_t, b)
    assert out.shape == ref.shape
    assert jnp.allclose(out, ref, atol=1e-4, rtol=1e-4), "mismatch vs reference"

    print("KERNEL_OK")
</pallas_src>

<mosaic_0001>
module attributes {stable_mosaic.version = 11 : i64} {
  func.func @adain_kernel(%arg0: i32, %arg1: memref<8x2xf32, #tpu.memory_space<vmem>>, %arg2: memref<8x256xf32, #tpu.memory_space<vmem>>, %arg3: memref<8x256xf32, #tpu.memory_space<vmem>>) attributes {dimension_semantics = [#tpu.dimension_semantics<parallel>], iteration_bounds = array<i64: 1>, scalar_prefetch = 0 : i64, scratch_operands = 0 : i64, tpu.core_type = #tpu.core_type<tc>, window_params = [{transform_indices = @transform_0, window_bounds = array<i64: 8, 2>}, {transform_indices = @transform_1, window_bounds = array<i64: 8, 256>}, {transform_indices = @transform_2, window_bounds = array<i64: 8, 256>}]} {
    %c0 = arith.constant 0 : index
    %c0_0 = arith.constant 0 : index
    %0 = vector.load %arg1[%c0, %c0_0] : memref<8x2xf32, #tpu.memory_space<vmem>>, vector<8x1xf32>
    %c0_1 = arith.constant 0 : index
    %c1 = arith.constant 1 : index
    %1 = vector.load %arg1[%c0_1, %c1] : memref<8x2xf32, #tpu.memory_space<vmem>>, vector<8x1xf32>
    %c0_2 = arith.constant 0 : index
    %c0_3 = arith.constant 0 : index
    %2 = vector.load %arg2[%c0_2, %c0_3] : memref<8x256xf32, #tpu.memory_space<vmem>>, vector<8x256xf32>
    %cst = arith.constant dense<0.000000e+00> : vector<8xf32>
    %3 = vector.multi_reduction <add>, %2, %cst [1] : vector<8x256xf32> to vector<8xf32>
    %4 = vector.shape_cast %3 : vector<8xf32> to vector<8x1xf32>
    %5 = arith.mulf %2, %2 : vector<8x256xf32>
    %cst_4 = arith.constant dense<0.000000e+00> : vector<8xf32>
    %6 = vector.multi_reduction <add>, %5, %cst_4 [1] : vector<8x256xf32> to vector<8xf32>
    %7 = vector.shape_cast %6 : vector<8xf32> to vector<8x1xf32>
    %cst_5 = arith.constant 3.906250e-03 : f32
    %8 = vector.broadcast %cst_5 : f32 to vector<8x1xf32>
    %9 = arith.mulf %4, %8 : vector<8x1xf32>
    %cst_6 = arith.constant 3.906250e-03 : f32
    %10 = vector.broadcast %cst_6 : f32 to vector<8x1xf32>
    %11 = arith.mulf %7, %10 : vector<8x1xf32>
    %12 = arith.mulf %9, %9 : vector<8x1xf32>
    %13 = arith.subf %11, %12 : vector<8x1xf32>
    %cst_7 = arith.constant 0.000000e+00 : f32
    %14 = vector.broadcast %cst_7 : f32 to vector<8x1xf32>
    %15 = arith.maximumf %13, %14 : vector<8x1xf32>
    %cst_8 = arith.constant 1.000000e+00 : f32
    %16 = vector.broadcast %cst_8 : f32 to vector<8x1xf32>
    %17 = arith.addf %16, %0 : vector<8x1xf32>
    %cst_9 = arith.constant 9.99999974E-6 : f32
    %18 = vector.broadcast %cst_9 : f32 to vector<8x1xf32>
    %19 = arith.addf %15, %18 : vector<8x1xf32>
    %20 = math.rsqrt %19 : vector<8x1xf32>
    %21 = arith.mulf %17, %20 : vector<8x1xf32>
    %22 = arith.mulf %9, %21 : vector<8x1xf32>
    %23 = arith.subf %1, %22 : vector<8x1xf32>
    %c0_10 = arith.constant 0 : index
    %c0_11 = arith.constant 0 : index
    %24 = vector.load %arg2[%c0_10, %c0_11] : memref<8x256xf32, #tpu.memory_space<vmem>>, vector<8x256xf32>
    %25 = vector.broadcast %21 : vector<8x1xf32> to vector<8x256xf32>
    %26 = arith.mulf %24, %25 : vector<8x256xf32>
    %27 = vector.broadcast %23 : vector<8x1xf32> to vector<8x256xf32>
    %28 = arith.addf %26, %27 : vector<8x256xf32>
    %c0_12 = arith.constant 0 : index
    %c0_13 = arith.constant 0 : index
    %29 = vector.load %arg3[%c0_12, %c0_13] : memref<8x256xf32, #tpu.memory_space<vmem>>, vector<8x256xf32>
    tpu.vector_store %arg3[%c0_12, %c0_13], %28 {strides = array<i32>} : memref<8x256xf32, #tpu.memory_space<vmem>>, vector<8x256xf32>,
    return
  }
  func.func @transform_0(%arg0: i32) -> (i32, i32) {
    %c0_i32 = arith.constant 0 : i32
    %c0_i32_0 = arith.constant 0 : i32
    return %arg0, %c0_i32 : i32, i32
  }
  func.func @transform_1(%arg0: i32) -> (i32, i32) {
    %c0_i32 = arith.constant 0 : i32
    %c0_i32_0 = arith.constant 0 : i32
    return %arg0, %c0_i32 : i32, i32
  }
  func.func @transform_2(%arg0: i32) -> (i32, i32) {
    %c0_i32 = arith.constant 0 : i32
    %c0_i32_0 = arith.constant 0 : i32
    return %arg0, %c0_i32 : i32, i32
  }
}

</mosaic_0001>

<bundles_post_ra>
// kernel: adain_forward.1
= control target key start
LH: loop header
LB: loop body
LE: loop exit
PB: predicated region body
PF: predicated region fallthrough
CT: control target
= control target key end

     0   :  { %v64_v6 = vmov 0   ;;  %v65_v15 = vmov 1   ;;  %s66_s14 = smov 1   ;;  %s97_s1 = inlined_call_operand.vmem [shape: f32[8,256], index: 1, kind: input, shape index: {}]   ;;  %s98_s0 = inlined_call_operand.vmem [shape: f32[8,2], index: 0, kind: input, shape index: {}]   ;;  %s99_s2 = inlined_call_operand.vmem [shape: f32[8,256], index: 2, kind: output, shape index: {}]  }
   0x1   :  { %v12_v0 = vld [vmem:[%s97_s1] sm:$0xff]  ;;  %v13_v1 = vld [vmem:[%s97_s1 + $0x8] sm:$0xff]  ;;  %60 = vset.pattern.permute.xlu1 %v64_v6  ;;  %61 = vset.pattern.permute.xlu0 %v65_v15 }
   0x2   :  { %v14_v2 = vadd.f32 %v13_v1, %v12_v0  ;;  %v17_v3 = vmul.f32 %v12_v0, %v12_v0  ;;  %v18_v4 = vmul.f32 %v13_v1, %v13_v1  ;;  %v11_v16 = vld [vmem:[%s98_s0] sm:$0xff] }
   0x3   :  { %v27_v17 = vadd.f32 1.0, %v11_v16 }
   0x4   :  { %15 = vadd.xlane.f32.xlu0 %v14_v2  ;;  %v19_v5 = vadd.f32 %v18_v4, %v17_v3 }
   0x8   :  { %20 = vadd.xlane.f32.xlu0 %v19_v5 }
  0x8d   :  { %v16_v7 = vpop.xlane.xlu0 %15 }
  0x8e   :  { %v22_v8 = vmul.f32 0.00390625, %v16_v7 }
  0x90   :  { %v24_v10 = vmul.f32 %v22_v8, %v22_v8 }
  0x91   :  { %v21_v9 = vpop.xlane.xlu0 %20 }
  0x92   :  { %v23_v11 = vmul.f32 0.00390625, %v21_v9 }
  0x94   :  { %v25_v12 = vsub.f32 %v23_v11, %v24_v10 }
  0x96   :  { %v26_v13 = vmax.f32 %v25_v12, 0.0 }
  0x98   :  { %v28_v14 = vadd.f32 1e-05, %v26_v13 }
  0x9a   :  { %62 = vrsqrt.f32 %v28_v14 }
  0xa7   :  { %v63_v18 = vpop.eup %62 }
  0xa8   :  { %v30_v19 = vmul.f32 %v63_v18, %v27_v17 }
  0xaa   :  { %v31_v20 = vmul.f32 %v30_v19, %v22_v8 }
  0xac   :  { %33 = vrot.lane.b32.xlu1 %v31_v20, %s66_s14 }
  0xb0   :  { %39 = vperm.xlu1 %60, %v30_v19  }
 0x11e   :  { %v34_v21 = vpop.permute.xlu1 %33 }
 0x11f   :  { %v36_v22 = vsub.f32 %v11_v16, %v34_v21 }
 0x121   :  { %46 = vperm.xlu0 %61, %v36_v22  }
 0x12b   :  { %v40_v23 = vpop.permute.xlu1 %39 }
 0x12c   :  { %v42_v24 = vmul.f32 %v40_v23, %v12_v0  ;;  %v43_v25 = vmul.f32 %v40_v23, %v13_v1 }
 0x19c   :  { %v47_v26 = vpop.permute.xlu0 %46 }
 0x19d   :  { %v49_v27 = vadd.f32 %v47_v26, %v42_v24  ;;  %v50_v28 = vadd.f32 %v47_v26, %v43_v25 }
 0x19f   :  { %51 = vst [vmem:[%s99_s2] sm:$0xff] %v49_v27  ;;  %52 = vst [vmem:[%s99_s2 + $0x8] sm:$0xff] %v50_v28 }

</bundles_post_ra>
